<compile_context>
chip_gen: v7x
topology: tpu7x:2x2x1
jax: 0.10.0
libtpu: 0.0.40
codegen_flags: <defaults>
</compile_context>

<pallas_src>
import functools
import math

import jax
import jax.numpy as jnp
from jax.experimental import pallas as pl
from jax.experimental.pallas import tpu as pltpu

LANE = 128


def _round_up(n, m):
    return ((n + m - 1) // m) * m


def _cls_pad(num_class, num_views):
    """Smallest per-view logit width so that views * width is a multiple of 128."""
    step = LANE // math.gcd(num_views, LANE)
    return _round_up(max(num_class, 1), step)


def pack_tcp_params(wcls, bcls, wconf, bconf, wmm, bmm):
    """One-time packing of per-view weights into fused, lane-dense MXU slabs.

    Inputs are "math ready" (y = x @ W + b):
      wcls:  (V, H, C)  per-view classifier weight
      bcls:  (V, 1, C)
      wconf: (V, H, 1)  per-view confidence weight
      bconf: (V, 1, 1)
      wmm:   (V, H, C)  MM classifier weight, rows in view-major order
      bmm:   (1, C)
    Returns dict: wfused (bf16), bfused (f32), wmm (bf16), bmm (f32).
    Call once at model init, NOT per forward.
    """
    V, H, C = wcls.shape
    vh = V * H
    cpad = _cls_pad(C, V)
    cls_w = V * cpad
    vh_pad = _round_up(vh, LANE)
    nf = cls_w + vh_pad
    mpad = _round_up(C, LANE)

    wfused = jnp.zeros((vh, nf), jnp.float32)
    bfused = jnp.zeros((1, nf), jnp.float32)
    for v in range(V):
        r0 = v * H
        # Per-view classifier block (block-diagonal over views).
        wfused = wfused.at[r0:r0 + H, v * cpad:v * cpad + C].set(wcls[v])
        bfused = bfused.at[:, v * cpad:v * cpad + C].set(bcls[v])
        # Per-view confidence column replicated over that view's H lanes so the
        # kernel's confidence map comes out lane-aligned with the concatenated
        # hidden features (no cross-lane broadcast inside the kernel).
        wfused = wfused.at[r0:r0 + H, cls_w + r0:cls_w + r0 + H].set(
            jnp.tile(wconf[v], (1, H)))
        bfused = bfused.at[:, cls_w + r0:cls_w + r0 + H].set(
            jnp.tile(bconf[v], (1, H)))

    wmm_pad = jnp.zeros((vh, mpad), jnp.float32).at[:, :C].set(wmm.reshape(vh, C))
    bmm_pad = jnp.zeros((1, mpad), jnp.float32).at[:, :C].set(bmm)

    return {
        "wfused": wfused.astype(jnp.bfloat16),   # bf16 only at the MXU boundary
        "bfused": bfused,                        # biases stay f32
        "wmm": wmm_pad.astype(jnp.bfloat16),
        "bmm": bmm_pad,
    }


def tcp_kernel(x_ref, wfused_ref, bfused_ref, wmm_ref, bmm_ref,
               tcplogit_ref, mmlogit_ref, *, cls_width, vh):
    """One batch tile: 2 MXU passes, no per-view loop.

    x_ref:        (TB, V*H)        f32   relu'd in-kernel
    wfused_ref:   (V*H, NF)        bf16  [0:cls_width]=block-diag classifier,
                                         [cls_width:cls_width+V*H]=replicated conf
    bfused_ref:   (1, NF)          f32
    wmm_ref:      (V*H, MPAD)      bf16
    bmm_ref:      (1, MPAD)        f32
    tcplogit_ref: (TB, cls_width)  f32   view v logits at [v*cpad : v*cpad+C]
    mmlogit_ref:  (TB, MPAD)       f32   real logits at [:C]
    """
    h = jnp.maximum(x_ref[...], 0.0)                      # (TB, VH) f32 (VPU)
    hb = h.astype(jnp.bfloat16)

    # Fused classifier + confidence: ONE MXU pass for all views.
    cc = jnp.dot(hb, wfused_ref[...],
                 preferred_element_type=jnp.float32) + bfused_ref[...]

    # Lane-dense, unmasked store of every view's logits.
    tcplogit_ref[...] = cc[:, :cls_width]

    # Confidence map, already replicated / lane-aligned with h (slice starts at
    # a 128-lane boundary -> no lane rotation).
    conf = cc[:, cls_width:cls_width + vh]                 # (TB, VH) f32
    feat = (h * conf).astype(jnp.bfloat16)                 # (TB, VH)

    # MM classifier: concat-over-views == a single K = V*H matmul.
    mmlogit_ref[...] = (jnp.dot(feat, wmm_ref[...],
                                preferred_element_type=jnp.float32)
                        + bmm_ref[...])


@functools.partial(jax.jit, static_argnames=("num_class", "block_b"))
def tcp_forward(features, wfused, bfused, wmm, bmm, *, num_class, block_b=512):
    """Eval-mode TCP forward. features: list of V arrays (B, H), f32.

    Returns (MMLoss, MMlogit (B, C), TCPLogit (V, B, C)).
    """
    V = len(features)
    B, H = features[0].shape
    vh = V * H
    cpad = _cls_pad(num_class, V)
    cls_w = V * cpad
    nf = wfused.shape[1]
    mpad = wmm.shape[1]
    assert wfused.shape == (vh, cls_w + _round_up(vh, LANE))
    assert wmm.shape[0] == vh

    # Batch tiling: multiple of 8 sublanes, capped so tiles stream through VMEM
    # (and shard over TensorCores) at production batch sizes.
    tb = min(block_b, _round_up(B, 8))
    b_pad = _round_up(B, tb)

    x_all = jnp.concatenate(features, axis=1)              # (B, V*H), view-major
    if b_pad != B:
        x_all = jnp.pad(x_all, ((0, b_pad - B), (0, 0)))

    kernel = functools.partial(tcp_kernel, cls_width=cls_w, vh=vh)

    tcplogit_p, mmlogit_p = pl.pallas_call(
        kernel,
        grid=(b_pad // tb,),
        in_specs=[
            pl.BlockSpec((tb, vh), lambda i: (i, 0)),
            pl.BlockSpec((vh, nf), lambda i: (0, 0)),
            pl.BlockSpec((1, nf), lambda i: (0, 0)),
            pl.BlockSpec((vh, mpad), lambda i: (0, 0)),
            pl.BlockSpec((1, mpad), lambda i: (0, 0)),
        ],
        out_specs=(
            pl.BlockSpec((tb, cls_w), lambda i: (i, 0)),
            pl.BlockSpec((tb, mpad), lambda i: (i, 0)),
        ),
        out_shape=(
            # NOTE: at very large B these stores dominate HBM traffic; switch
            # to bfloat16 here if the consumer tolerates it.
            jax.ShapeDtypeStruct((b_pad, cls_w), jnp.float32),
            jax.ShapeDtypeStruct((b_pad, mpad), jnp.float32),
        ),
        compiler_params=pltpu.CompilerParams(
            dimension_semantics=("parallel",)),
    )(x_all, wfused, bfused, wmm, bmm)

    tcplogit = tcplogit_p[:B].reshape(B, V, cpad)[:, :, :num_class]
    tcplogit = jnp.transpose(tcplogit, (1, 0, 2))           # (V, B, C)
    mmlogit = mmlogit_p[:B, :num_class]

    mmloss = jnp.float32(0.0)  # Training=False path
    return mmloss, mmlogit, tcplogit


def tcp_reference(features, wcls, bcls, wconf, bconf, wmm, bmm,
                  matmul_dtype=jnp.float32):
    """Pure-JAX reference mirroring the PyTorch forward (eval mode).

    matmul_dtype=bfloat16 reproduces the kernel's MXU-boundary casts exactly.
    """
    V, H, C = wcls.shape
    feats, logits = [], []
    for v in range(V):
        h = jnp.maximum(features[v], 0.0)
        hm = h.astype(matmul_dtype)
        logit = jnp.dot(hm, wcls[v].astype(matmul_dtype),
                        preferred_element_type=jnp.float32) + bcls[v]
        conf = jnp.dot(hm, wconf[v].astype(matmul_dtype),
                       preferred_element_type=jnp.float32) + bconf[v]
        feats.append((h * conf).astype(matmul_dtype))
        logits.append(logit)
    mmfeat = jnp.concatenate(feats, axis=1)                 # (B, V*H)
    wmm_flat = wmm.astype(matmul_dtype).reshape(V * H, C)
    mmlogit = jnp.dot(mmfeat, wmm_flat,
                      preferred_element_type=jnp.float32) + bmm[0]
    return mmlogit, jnp.stack(logits, axis=0)


if __name__ == "__main__":
    # Module config: in_dim has `views` entries, hidden_dim=[32] -> MMClasifier
    # is a single Linear(views*32, num_class).
    views, batch, hidden, num_class = 2, 8, 32, 4

    key = jax.random.PRNGKey(0)
    ks = jax.random.split(key, 8)
    scale = 1.0 / (hidden ** 0.5)

    feats = [jax.random.normal(ks[v], (batch, hidden), jnp.float32)
             for v in range(views)]
    wcls = jax.random.normal(ks[2], (views, hidden, num_class), jnp.float32) * scale
    bcls = jax.random.normal(ks[3], (views, 1, num_class), jnp.float32) * 0.1
    wconf = jax.random.normal(ks[4], (views, hidden, 1), jnp.float32) * scale
    bconf = jax.random.normal(ks[5], (views, 1, 1), jnp.float32) * 0.1
    wmm = jax.random.normal(ks[6], (views, hidden, num_class), jnp.float32) * scale
    bmm = jax.random.normal(ks[7], (1, num_class), jnp.float32) * 0.1

    # Pack weights ONCE (model init), then run the jitted forward.
    packed = pack_tcp_params(wcls, bcls, wconf, bconf, wmm, bmm)
    mmloss, mmlogit, tcplogit = tcp_forward(
        feats, packed["wfused"], packed["bfused"], packed["wmm"], packed["bmm"],
        num_class=num_class)
    jax.block_until_ready((mmloss, mmlogit, tcplogit))

    # Tight check against a reference with identical bf16-at-MXU casts.
    ref_mm_bf, ref_tcp_bf = tcp_reference(feats, wcls, bcls, wconf, bconf, wmm, bmm,
                                          matmul_dtype=jnp.bfloat16)
    assert jnp.allclose(mmlogit, ref_mm_bf, atol=1e-2, rtol=1e-2)
    assert jnp.allclose(tcplogit, ref_tcp_bf, atol=1e-2, rtol=1e-2)

    # Loose sanity check against the pure-f32 PyTorch-semantics reference.
    ref_mm_f32, ref_tcp_f32 = tcp_reference(feats, wcls, bcls, wconf, bconf, wmm, bmm,
                                            matmul_dtype=jnp.float32)
    assert jnp.allclose(mmlogit, ref_mm_f32, atol=1e-1, rtol=1e-1)
    assert jnp.allclose(tcplogit, ref_tcp_f32, atol=1e-1, rtol=1e-1)

    assert float(mmloss) == 0.0
    print("KERNEL_OK")
</pallas_src>

<mosaic_0001>
module attributes {stable_mosaic.version = 11 : i64} {
  func.func @tcp_kernel(%arg0: i32, %arg1: memref<8x64xf32, #tpu.memory_space<vmem>>, %arg2: memref<64x256xbf16, #tpu.memory_space<vmem>>, %arg3: memref<1x256xf32, #tpu.memory_space<vmem>>, %arg4: memref<64x128xbf16, #tpu.memory_space<vmem>>, %arg5: memref<1x128xf32, #tpu.memory_space<vmem>>, %arg6: memref<8x128xf32, #tpu.memory_space<vmem>>, %arg7: memref<8x128xf32, #tpu.memory_space<vmem>>) attributes {dimension_semantics = [#tpu.dimension_semantics<parallel>], iteration_bounds = array<i64: 1>, scalar_prefetch = 0 : i64, scratch_operands = 0 : i64, tpu.core_type = #tpu.core_type<tc>, window_params = [{transform_indices = @transform_0, window_bounds = array<i64: 8, 64>}, {pipeline_mode = #tpu.pipeline_mode<synchronous>, transform_indices = @transform_1, window_bounds = array<i64: 64, 256>}, {pipeline_mode = #tpu.pipeline_mode<synchronous>, transform_indices = @transform_2, window_bounds = array<i64: 1, 256>}, {pipeline_mode = #tpu.pipeline_mode<synchronous>, transform_indices = @transform_3, window_bounds = array<i64: 64, 128>}, {pipeline_mode = #tpu.pipeline_mode<synchronous>, transform_indices = @transform_4, window_bounds = array<i64: 1, 128>}, {transform_indices = @transform_5, window_bounds = array<i64: 8, 128>}, {transform_indices = @transform_6, window_bounds = array<i64: 8, 128>}]} {
    %c0 = arith.constant 0 : index
    %c0_0 = arith.constant 0 : index
    %0 = vector.load %arg1[%c0, %c0_0] : memref<8x64xf32, #tpu.memory_space<vmem>>, vector<8x64xf32>
    %cst = arith.constant 0.000000e+00 : f32
    %1 = vector.broadcast %cst : f32 to vector<8x64xf32>
    %2 = arith.maximumf %0, %1 : vector<8x64xf32>
    %3 = arith.truncf %2 : vector<8x64xf32> to vector<8x64xbf16>
    %c0_1 = arith.constant 0 : index
    %c0_2 = arith.constant 0 : index
    %4 = vector.load %arg2[%c0_1, %c0_2] : memref<64x256xbf16, #tpu.memory_space<vmem>>, vector<64x256xbf16>
    %cst_3 = arith.constant dense<0.000000e+00> : vector<8x256xf32>
    %5 = tpu.matmul %3, %4, %cst_3 {dimension_numbers = #tpu.dot_dimension_numbers<[1], [0], [0], [1], [0, 0, 1, 1], [], []>} : vector<8x64xbf16>, vector<64x256xbf16>, vector<8x256xf32> -> vector<8x256xf32>
    %c0_4 = arith.constant 0 : index
    %c0_5 = arith.constant 0 : index
    %6 = vector.load %arg3[%c0_4, %c0_5] : memref<1x256xf32, #tpu.memory_space<vmem>>, vector<1x256xf32>
    %7 = vector.broadcast %6 : vector<1x256xf32> to vector<8x256xf32>
    %8 = arith.addf %5, %7 : vector<8x256xf32>
    %9 = vector.extract_strided_slice %8 {offsets = [0, 0], sizes = [8, 128], strides = [1, 1]} : vector<8x256xf32> to vector<8x128xf32>
    %c0_6 = arith.constant 0 : index
    %c0_7 = arith.constant 0 : index
    %10 = vector.load %arg6[%c0_6, %c0_7] : memref<8x128xf32, #tpu.memory_space<vmem>>, vector<8x128xf32>
    tpu.vector_store %arg6[%c0_6, %c0_7], %9 {strides = array<i32>} : memref<8x128xf32, #tpu.memory_space<vmem>>, vector<8x128xf32>,
    %11 = vector.extract_strided_slice %8 {offsets = [0, 128], sizes = [8, 64], strides = [1, 1]} : vector<8x256xf32> to vector<8x64xf32>
    %12 = arith.mulf %2, %11 : vector<8x64xf32>
    %13 = arith.truncf %12 : vector<8x64xf32> to vector<8x64xbf16>
    %c0_8 = arith.constant 0 : index
    %c0_9 = arith.constant 0 : index
    %14 = vector.load %arg4[%c0_8, %c0_9] : memref<64x128xbf16, #tpu.memory_space<vmem>>, vector<64x128xbf16>
    %cst_10 = arith.constant dense<0.000000e+00> : vector<8x128xf32>
    %15 = tpu.matmul %13, %14, %cst_10 {dimension_numbers = #tpu.dot_dimension_numbers<[1], [0], [0], [1], [0, 0, 1, 1], [], []>} : vector<8x64xbf16>, vector<64x128xbf16>, vector<8x128xf32> -> vector<8x128xf32>
    %c0_11 = arith.constant 0 : index
    %c0_12 = arith.constant 0 : index
    %16 = vector.load %arg5[%c0_11, %c0_12] : memref<1x128xf32, #tpu.memory_space<vmem>>, vector<1x128xf32>
    %17 = vector.broadcast %16 : vector<1x128xf32> to vector<8x128xf32>
    %18 = arith.addf %15, %17 : vector<8x128xf32>
    %c0_13 = arith.constant 0 : index
    %c0_14 = arith.constant 0 : index
    %19 = vector.load %arg7[%c0_13, %c0_14] : memref<8x128xf32, #tpu.memory_space<vmem>>, vector<8x128xf32>
    tpu.vector_store %arg7[%c0_13, %c0_14], %18 {strides = array<i32>} : memref<8x128xf32, #tpu.memory_space<vmem>>, vector<8x128xf32>,
    return
  }
  func.func @transform_0(%arg0: i32) -> (i32, i32) {
    %c0_i32 = arith.constant 0 : i32
    %c0_i32_0 = arith.constant 0 : i32
    return %arg0, %c0_i32 : i32, i32
  }
  func.func @transform_1(%arg0: i32) -> (i32, i32) {
    %c0_i32 = arith.constant 0 : i32
    %c0_i32_0 = arith.constant 0 : i32
    %c0_i32_1 = arith.constant 0 : i32
    return %c0_i32, %c0_i32_0 : i32, i32
  }
  func.func @transform_2(%arg0: i32) -> (i32, i32) {
    %c0_i32 = arith.constant 0 : i32
    %c0_i32_0 = arith.constant 0 : i32
    %c0_i32_1 = arith.constant 0 : i32
    return %c0_i32, %c0_i32_0 : i32, i32
  }
  func.func @transform_3(%arg0: i32) -> (i32, i32) {
    %c0_i32 = arith.constant 0 : i32
    %c0_i32_0 = arith.constant 0 : i32
    %c0_i32_1 = arith.constant 0 : i32
    return %c0_i32, %c0_i32_0 : i32, i32
  }
  func.func @transform_4(%arg0: i32) -> (i32, i32) {
    %c0_i32 = arith.constant 0 : i32
    %c0_i32_0 = arith.constant 0 : i32
    %c0_i32_1 = arith.constant 0 : i32
    return %c0_i32, %c0_i32_0 : i32, i32
  }
  func.func @transform_5(%arg0: i32) -> (i32, i32) {
    %c0_i32 = arith.constant 0 : i32
    %c0_i32_0 = arith.constant 0 : i32
    return %arg0, %c0_i32 : i32, i32
  }
  func.func @transform_6(%arg0: i32) -> (i32, i32) {
    %c0_i32 = arith.constant 0 : i32
    %c0_i32_0 = arith.constant 0 : i32
    return %arg0, %c0_i32 : i32, i32
  }
}

</mosaic_0001>

<bundles_post_ra>
// kernel: tcp_forward.1
= control target key start
LH: loop header
LB: loop body
LE: loop exit
PB: predicated region body
PF: predicated region fallthrough
CT: control target
= control target key end

     0   :  { %12 = vsyncpa [#allocation3], 0  ;;  %s318_s21 = smov [#allocation2]   ;;  %s400_s0 = inlined_call_operand.vmem [shape: f32[8,64], index: 0, kind: input, shape index: {}]   ;;  %s401_s1 = inlined_call_operand.hbm [shape: bf16[64,256], index: 1, kind: input, shape index: {}]   ;;  %s402_s2 = inlined_call_operand.vmem [shape: f32[1,256], index: 2, kind: input, shape index: {}]   ;;  %s403_s3 = inlined_call_operand.vmem [shape: bf16[64,128], index: 3, kind: input, shape index: {}]   ;;  %s404_s4 = inlined_call_operand.vmem [shape: f32[1,128], index: 4, kind: input, shape index: {}]   ;;  %s405_s5 = inlined_call_operand.vmem [shape: f32[8,128], index: 5, kind: output, shape index: {0}]   ;;  %s406_s6 = inlined_call_operand.vmem [shape: f32[8,128], index: 6, kind: output, shape index: {1}]  }
   0x1   :  { %s20_s22 = sshll.u32 %s318_s21, 4  ;;  %s294_s25 = scalar_lea.hbm %s401_s1, 1024  ;;  %s21_s22 = int_to_ptr.vmem [resolvable:$true] %s20_s22 }
   0x2   :  { %p295_p0 = scmp.ne.s32.totalorder %s401_s1, %s294_s25  ;;  %p298_p1 = scmp.lt.u32.totalorder %s294_s25, %s401_s1 }
   0x4   :  { %p300_p2 = pnand %p298_p1, %p295_p0 }
   0x6   :  { %303 = shalt.err (!%p300_p2)
}
   0x7   :  { %s304_s30 = scalar_lea.vmem %s21_s22, 1024  ;;  %p309_p4 = scmp.lt.s32.totalorder %s21_s22, %s21_s22 }
   0x8   :  { %p305_p3 = scmp.ne.s32.totalorder %s21_s22, %s304_s30  ;;  %p310_p5 = scmp.lt.s32.totalorder %s304_s30, %s304_s30 }
   0xa   :  { %p311_p6 = por %p310_p5, %p309_p4 }
   0xc   :  { %p312_p7 = pnand %p311_p6, %p305_p3 }
   0xe   :  { %315 = shalt.err (!%p312_p7)
}
   0xf   :  { %s319_s7 = smov 128   ;;  %s320_s8 = smov 8  }
  0x10   :  { %26 = dma.hbm_to_vmem [thread:$0]  %s401_s1, 1024, %s21_s22, [#allocation3], %s319_s7, %s319_s7, %s320_s8  }
  0x11   :  { %316 = dma.done.wait [#allocation3], 1024  }
  0x12   :  { %317 = vsyncadd [#allocation3], 4294966272  ;;  %v321_v0 = vmov 0   ;;  %v322_v1 = vmov 0.0   ;;  %v278_v2 = vld [vmem:[#allocation2 + $0x4] ss:$8 sps:$4 sm:$0xff]   ;;  %v50_v17 = vlaneseq }
  0x13   :  { %136 = vmatprep.mubr.bf16.mxu0 %v321_v0  ;;  %260 = vmatprep.subr.bf16.mxu1 %v322_v1  ;;  %v280_v3 = vld [vmem:[#allocation2] ss:$8 sps:$4 sm:$0xff]   ;;  %v281_v4 = vld [vmem:[#allocation2 + $0x14] ss:$8 sps:$4 sm:$0xff]   ;;  %v283_v5 = vld [vmem:[#allocation2 + $0x10] ss:$8 sps:$4 sm:$0xff]  }
  0x14   :  { %104 = vmatprep.subr.bf16.mxu0 %v278_v2  ;;  %v284_v6 = vld [vmem:[#allocation2 + $0x24] ss:$8 sps:$4 sm:$0xff]   ;;  %v286_v7 = vld [vmem:[#allocation2 + $0x20] ss:$8 sps:$4 sm:$0xff]   ;;  %v287_v8 = vld [vmem:[#allocation2 + $0x34] ss:$8 sps:$4 sm:$0xff]  }
  0x15   :  { %105 = vmatpush1.bf16.msra.mxu0 %v280_v3  ;;  %v290_v9 = vld [vmem:[%s403_s3] sm:$0xff]   ;;  %v291_v11 = vld [vmem:[%s403_s3 + $0x8] sm:$0xff]   ;;  %v289_v13 = vld [vmem:[#allocation2 + $0x30] ss:$8 sps:$4 sm:$0xff]   ;;  %vm100_vm0 = vcmask 523264   ;;  %vm323_vm1 = vmmov 0  }
  0x16   :  { %106 = vmatprep.subr.bf16.mxu0 %v281_v4  ;;  %v37_v10 = vld [vmem:[%s400_s0] sm:$0xff]  ;;  %261 = vmatpush3.bf16.msra.mxu1 %v290_v9  ;;  %v292_v15 = vld [vmem:[%s403_s3 + $0x10] sm:$0xff]   ;;  %v293_v16 = vld [vmem:[%s403_s3 + $0x18] sm:$0xff]   ;;  %v51_v18 = vshrl.u32 %v50_v17, 7 }
  0x17   :  { %262 = vmatprep.subr.bf16.mxu1 %v322_v1  ;;  %v38_v12 = vmax.f32 %v37_v10, 0.0  ;;  %268 = vmatprep.mubr.msk.bf16.mxu1 %vm323_vm1, %v322_v1  ;;  %v48_v20 = vld [vmem:[%s402_s2] sm:$0x3] }
  0x18   :  { %v52_v19 = vsub.s32 0, %v51_v18  ;;  %v56_v21 = vsub.s32 1, %v51_v18  ;;  %v249_v32 = vld [vmem:[%s404_s4] ss:$0 sm:$0xff] }
  0x19   :  { %107 = vmatpush1.bf16.msra.mxu0 %v283_v5  ;;  %v39_v14 = vpack.c.bf16 %v38_v12, %v38_v12 }
  0x1a   :  { %108 = vmatprep.subr.bf16.mxu0 %v284_v6  ;;  %263 = vmatpush3.bf16.msra.mxu1 %v291_v11  ;;  %v53_v22 = vrot.slane %v48_v20, %v52_v19  ;;  %v57_v23 = vrot.slane %v48_v20, %v56_v21 }
  0x1b   :  { %264 = vmatprep.subr.bf16.mxu1 %v322_v1 }
  0x1d   :  { %109 = vmatpush1.bf16.msra.mxu0 %v286_v7 }
  0x1e   :  { %110 = vmatprep.subr.bf16.mxu0 %v287_v8  ;;  %265 = vmatpush3.bf16.msra.mxu1 %v292_v15 }
  0x1f   :  { %266 = vmatprep.subr.bf16.mxu1 %v322_v1 }
  0x21   :  { %111 = vmatpush1.bf16.msra.mxu0 %v289_v13 }
  0x22   :  { %267 = vmatpush3.bf16.msra.mxu1 %v293_v16 }
  0x24   :  { %248 = vmatmul.mubr.msk.bf16.vlgmr.msra.gmra.mrb[0].mxu0 %vm100_vm0, %v39_v14 }
  0xf7   :  { %v138_v24 = vpop.f32.mrb[0].mxu0 }
  0xf8   :  { %v139_v25 = vadd.f32 %v138_v24, %v53_v22  ;;  %v140_v26 = vpop.f32.mrb[1].mxu0 }
  0xf9   :  { %v141_v27 = vadd.f32 %v140_v26, %v57_v23  ;;  %v142_v28 = vpop.f32.mrb[2].mxu0 }
  0xfa   :  { %145 = vst [vmem:[%s405_s5] sm:$0xff] %v139_v25  ;;  %v143_v29 = vpop.f32.mrb[3].mxu0 }
  0xfb   :  { %v146_v30 = vmul.f32 %v141_v27, %v38_v12 }
  0xfd   :  { %v147_v31 = vpack.c.bf16 %v146_v30, %v146_v30 }
  0xff   :  { %269 = vmatmul.mubr.msk.bf16.vlgmr.msra.gmra.mrb[0].mxu1 %vm100_vm0, %v147_v31 }
 0x1d2   :  { %v224_v33 = vpop.f32.mrb[0].mxu1 }
 0x1d3   :  { %v225_v34 = vadd.f32 %v249_v32, %v224_v33  ;;  %v270_v35 = vpop.f32.mrb[1].mxu1 }
 0x1d4   :  { %v227_v36 = vpop.f32.mrb[2].mxu1 }
 0x1d5   :  { %230 = vst [vmem:[%s406_s6] sm:$0xff] %v225_v34  ;;  %v271_v37 = vpop.f32.mrb[3].mxu1 }
 0x1d6   :  { %239 = vsyncpa [#allocation3], 1 }

</bundles_post_ra>
